<compile_context>
chip_gen: v7x
topology: tpu7x:2x2x1
jax: 0.10.0
libtpu: 0.0.40
codegen_flags: <defaults>
</compile_context>

<pallas_src>
import functools

import jax
import jax.numpy as jnp
from jax.experimental import pallas as pl
from jax.experimental.pallas import tpu as pltpu

LANE = 128


# ----------------------------------------------------------------------------
# Kernels
# ----------------------------------------------------------------------------
def gin_layer_kernel(a_ref, x_ref, w1_ref, b1_ref, w2_ref, b2_ref, wg1_ref,
                     out_ref, acc_ref):
    """conv1 (GINConv, eps=0) + ReLU, plus conv2's feature transform (h @ Wg1)."""
    k = pl.program_id(1)

    @pl.when(k == 0)
    def _():
        acc_ref[...] = jnp.zeros_like(acc_ref)

    # agg_i = sum_j (A + I)[i, j] * x_j   (self loop folded into A_hat)
    acc_ref[...] += jnp.dot(a_ref[...], x_ref[...],
                            preferred_element_type=jnp.float32)

    @pl.when(k == pl.num_programs(1) - 1)
    def _():
        agg = acc_ref[...].astype(jnp.bfloat16)
        h = jnp.dot(agg, w1_ref[...],
                    preferred_element_type=jnp.float32) + b1_ref[...]
        h = jnp.maximum(h, 0.0)                                   # MLP ReLU
        h = jnp.dot(h.astype(jnp.bfloat16), w2_ref[...],
                    preferred_element_type=jnp.float32) + b2_ref[...]
        h = jnp.maximum(h, 0.0)                                   # post-conv1 ReLU
        hw = jnp.dot(h.astype(jnp.bfloat16), wg1_ref[...],
                     preferred_element_type=jnp.float32)          # conv2's h @ W
        out_ref[...] = hw.astype(out_ref.dtype)


def gcn_mid_kernel(n_ref, hw_ref, bg_ref, wnext_ref, out_ref, acc_ref):
    """conv2 aggregation (Nhat @ hw + b), dropout(identity), conv3's h @ Wg2."""
    k = pl.program_id(1)

    @pl.when(k == 0)
    def _():
        acc_ref[...] = jnp.zeros_like(acc_ref)

    acc_ref[...] += jnp.dot(n_ref[...], hw_ref[...],
                            preferred_element_type=jnp.float32)

    @pl.when(k == pl.num_programs(1) - 1)
    def _():
        h = acc_ref[...] + bg_ref[...]
        # TODO(synk): dropout(p=0.1) implemented as eval-mode identity
        # (training-mode mask would need pltpu.prng_seed + prng_random_bits).
        hw = jnp.dot(h.astype(jnp.bfloat16), wnext_ref[...],
                     preferred_element_type=jnp.float32)
        out_ref[...] = hw.astype(out_ref.dtype)


def gcn_final_kernel(n_ref, hw_ref, bg_ref, wl_ref, bl_ref,
                     logp_ref, emb_ref, acc_ref, *, out_size):
    """conv3 aggregation, emit x_emb, final Linear + log_softmax (f32)."""
    k = pl.program_id(1)

    @pl.when(k == 0)
    def _():
        acc_ref[...] = jnp.zeros_like(acc_ref)

    acc_ref[...] += jnp.dot(n_ref[...], hw_ref[...],
                            preferred_element_type=jnp.float32)

    @pl.when(k == pl.num_programs(1) - 1)
    def _():
        h = acc_ref[...] + bg_ref[...]
        emb_ref[...] = h                                           # x_emb
        logits = jnp.dot(h.astype(jnp.bfloat16), wl_ref[...],
                         preferred_element_type=jnp.float32) + bl_ref[...]
        # Mask out the zero-padded logit columns before the softmax.
        lane = jax.lax.broadcasted_iota(jnp.int32, logits.shape, 1)
        logits = jnp.where(lane < out_size, logits, -1e30)
        m = jnp.max(logits, axis=1, keepdims=True)
        z = logits - m
        lse = jnp.log(jnp.sum(jnp.exp(z), axis=1, keepdims=True))
        logp_ref[...] = z - lse


# ----------------------------------------------------------------------------
# Graph densification + padding (plain JAX, outside the kernels)
# ----------------------------------------------------------------------------
def _round_up(v, m):
    return ((v + m - 1) // m) * m


def _pick_tile(n):
    # Lane-aligned row/k tile.  Small graphs fit one block (no padding waste);
    # large graphs stream 512-wide tiles (2 x 512x512 bf16 double buffers are
    # only 1 MiB of VMEM, and bigger tiles amortize per-grid-step overhead and
    # cut re-reads of the dense feature operand per row tile).
    return int(min(512, max(128, _round_up(n, 128))))


def _pad2d(a, rows, cols, dtype):
    out = jnp.zeros((rows, cols), dtype)
    return out.at[: a.shape[0], : a.shape[1]].set(a.astype(dtype))


def build_dense_graph(edge_index, num_nodes, n_pad):
    """edge_index (2, E) int32, row0=src, row1=dst (PyG convention).

    A_hat = A + I (GIN eps=0 self loop folded in); Nhat = D^-1/2 A_hat D^-1/2.
    Padded rows/cols are all zero (no self loop, zero degree handled), so
    padded nodes never contaminate real nodes."""
    src = edge_index[0]
    dst = edge_index[1]
    ones = jnp.ones(src.shape, jnp.float32)
    A = jnp.zeros((n_pad, n_pad), jnp.float32).at[dst, src].add(ones)
    node_mask = (jnp.arange(n_pad) < num_nodes).astype(jnp.float32)
    A_hat = A + jnp.diag(node_mask)                 # self loops on real nodes only
    deg = jnp.sum(A_hat, axis=1)
    dinv = jnp.where(deg > 0, jax.lax.rsqrt(jnp.maximum(deg, 1e-12)), 0.0)
    Nhat = dinv[:, None] * A_hat * dinv[None, :]
    return A_hat.astype(jnp.bfloat16), Nhat.astype(jnp.bfloat16)


def _prepare(x, edge_index, params, tile):
    n, in_size = x.shape
    (w1, b1, w2, b2, wg1, bg1, wg2, bg2, wl, bl) = params
    hid = w2.shape[1]
    out = wl.shape[1]
    n_pad = _round_up(n, tile)
    f_pad = _round_up(in_size, LANE)
    h_pad = _round_up(hid, LANE)
    o_pad = _round_up(out, LANE)
    A_hat, Nhat = build_dense_graph(edge_index, n, n_pad)
    bf, f32 = jnp.bfloat16, jnp.float32
    return dict(
        num_nodes=n, hid_size=hid, out_size=out,
        n_pad=n_pad, f_pad=f_pad, h_pad=h_pad, o_pad=o_pad,
        A_hat=A_hat, Nhat=Nhat,
        x_p=_pad2d(x, n_pad, f_pad, bf),
        w1=_pad2d(w1, f_pad, h_pad, bf), b1=_pad2d(b1, 1, h_pad, f32),
        w2=_pad2d(w2, h_pad, h_pad, bf), b2=_pad2d(b2, 1, h_pad, f32),
        wg1=_pad2d(wg1, h_pad, h_pad, bf), bg1=_pad2d(bg1, 1, h_pad, f32),
        wg2=_pad2d(wg2, h_pad, h_pad, bf), bg2=_pad2d(bg2, 1, h_pad, f32),
        wl=_pad2d(wl, h_pad, o_pad, bf), bl=_pad2d(bl, 1, o_pad, f32),
    )


# ----------------------------------------------------------------------------
# Forward pass
# ----------------------------------------------------------------------------
def gin_forward(x, edge_index, params, tile=None):
    if tile is None:
        tile = _pick_tile(x.shape[0])
    p = _prepare(x, edge_index, params, tile)
    n_pad, f_pad, h_pad, o_pad = p["n_pad"], p["f_pad"], p["h_pad"], p["o_pad"]
    tm = tk = tile
    grid = (n_pad // tm, n_pad // tk)

    cparams = pltpu.CompilerParams(
        dimension_semantics=("parallel", "arbitrary"),
        vmem_limit_bytes=32 * 1024 * 1024,
    )

    def full(r, c):
        return pl.BlockSpec((r, c), lambda i, k: (0, 0))

    # --- kernel 1: GINConv + ReLU (+ conv2 feature transform) ----------------
    hw1 = pl.pallas_call(
        gin_layer_kernel,
        out_shape=jax.ShapeDtypeStruct((n_pad, h_pad), jnp.bfloat16),
        grid_spec=pltpu.PrefetchScalarGridSpec(
            num_scalar_prefetch=0,
            grid=grid,
            in_specs=[
                pl.BlockSpec((tm, tk), lambda i, k: (i, k)),      # A_hat (streamed)
                pl.BlockSpec((tk, f_pad), lambda i, k: (k, 0)),   # x (k-tiled)
                full(f_pad, h_pad),                               # w1
                full(1, h_pad),                                   # b1
                full(h_pad, h_pad),                               # w2
                full(1, h_pad),                                   # b2
                full(h_pad, h_pad),                               # wg1
            ],
            out_specs=pl.BlockSpec((tm, h_pad), lambda i, k: (i, 0)),
            scratch_shapes=[pltpu.VMEM((tm, f_pad), jnp.float32)],
        ),
        compiler_params=cparams,
        cost_estimate=pl.CostEstimate(
            flops=2 * n_pad * n_pad * f_pad + 2 * n_pad * f_pad * h_pad
                  + 4 * n_pad * h_pad * h_pad,
            transcendentals=0,
            bytes_accessed=2 * n_pad * n_pad + 2 * n_pad * f_pad
                           + 2 * (f_pad * h_pad + 2 * h_pad * h_pad)
                           + 8 * h_pad + 2 * n_pad * h_pad),
    )(p["A_hat"], p["x_p"], p["w1"], p["b1"], p["w2"], p["b2"], p["wg1"])

    # --- kernel 2: GCNConv #2 + dropout(identity) (+ conv3 transform) --------
    hw2 = pl.pallas_call(
        gcn_mid_kernel,
        out_shape=jax.ShapeDtypeStruct((n_pad, h_pad), jnp.bfloat16),
        grid_spec=pltpu.PrefetchScalarGridSpec(
            num_scalar_prefetch=0,
            grid=grid,
            in_specs=[
                pl.BlockSpec((tm, tk), lambda i, k: (i, k)),      # Nhat (streamed)
                pl.BlockSpec((tk, h_pad), lambda i, k: (k, 0)),   # hw1 (k-tiled)
                full(1, h_pad),                                   # bg1
                full(h_pad, h_pad),                               # wg2
            ],
            out_specs=pl.BlockSpec((tm, h_pad), lambda i, k: (i, 0)),
            scratch_shapes=[pltpu.VMEM((tm, h_pad), jnp.float32)],
        ),
        compiler_params=cparams,
        cost_estimate=pl.CostEstimate(
            flops=2 * n_pad * n_pad * h_pad + 2 * n_pad * h_pad * h_pad,
            transcendentals=0,
            bytes_accessed=2 * n_pad * n_pad + 4 * n_pad * h_pad
                           + 2 * h_pad * h_pad + 4 * h_pad),
    )(p["Nhat"], hw1, p["bg1"], p["wg2"])

    # --- kernel 3: GCNConv #3 + Linear + log_softmax --------------------------
    logp_pad, emb_pad = pl.pallas_call(
        functools.partial(gcn_final_kernel, out_size=p["out_size"]),
        out_shape=(jax.ShapeDtypeStruct((n_pad, o_pad), jnp.float32),
                   jax.ShapeDtypeStruct((n_pad, h_pad), jnp.float32)),
        grid_spec=pltpu.PrefetchScalarGridSpec(
            num_scalar_prefetch=0,
            grid=grid,
            in_specs=[
                pl.BlockSpec((tm, tk), lambda i, k: (i, k)),      # Nhat (streamed)
                pl.BlockSpec((tk, h_pad), lambda i, k: (k, 0)),   # hw2 (k-tiled)
                full(1, h_pad),                                   # bg2
                full(h_pad, o_pad),                               # wl
                full(1, o_pad),                                   # bl
            ],
            out_specs=(pl.BlockSpec((tm, o_pad), lambda i, k: (i, 0)),
                       pl.BlockSpec((tm, h_pad), lambda i, k: (i, 0))),
            scratch_shapes=[pltpu.VMEM((tm, h_pad), jnp.float32)],
        ),
        compiler_params=cparams,
        cost_estimate=pl.CostEstimate(
            flops=2 * n_pad * n_pad * h_pad + 2 * n_pad * h_pad * o_pad
                  + 6 * n_pad * o_pad,
            transcendentals=n_pad * o_pad + n_pad,
            bytes_accessed=2 * n_pad * n_pad + 2 * n_pad * h_pad
                           + 2 * h_pad * o_pad + 4 * (h_pad + o_pad)
                           + 4 * n_pad * (h_pad + o_pad)),
    )(p["Nhat"], hw2, p["bg2"], p["wl"], p["bl"])

    n = p["num_nodes"]
    return logp_pad[:n, :p["out_size"]], emb_pad[:n, :p["hid_size"]]


# ----------------------------------------------------------------------------
# Pure-JAX reference (same bf16/f32 numerics) and param init
# ----------------------------------------------------------------------------
def gin_reference(x, edge_index, params, tile=None):
    if tile is None:
        tile = _pick_tile(x.shape[0])
    p = _prepare(x, edge_index, params, tile)
    bf, f32 = jnp.bfloat16, jnp.float32
    agg = jnp.dot(p["A_hat"], p["x_p"], preferred_element_type=f32)
    h = jnp.maximum(jnp.dot(agg.astype(bf), p["w1"],
                            preferred_element_type=f32) + p["b1"], 0.0)
    h = jnp.dot(h.astype(bf), p["w2"], preferred_element_type=f32) + p["b2"]
    h = jnp.maximum(h, 0.0)
    hw1 = jnp.dot(h.astype(bf), p["wg1"], preferred_element_type=f32).astype(bf)
    h2 = jnp.dot(p["Nhat"], hw1, preferred_element_type=f32) + p["bg1"]
    hw2 = jnp.dot(h2.astype(bf), p["wg2"], preferred_element_type=f32).astype(bf)
    h3 = jnp.dot(p["Nhat"], hw2, preferred_element_type=f32) + p["bg2"]
    logits = jnp.dot(h3.astype(bf), p["wl"], preferred_element_type=f32) + p["bl"]
    logits = logits[:p["num_nodes"], :p["out_size"]]
    return jax.nn.log_softmax(logits, axis=1), h3[:p["num_nodes"], :p["hid_size"]]


def init_params(key, in_size, hid_size, out_size):
    ks = jax.random.split(key, 10)

    def lin(kw, kb, fan_in, fan_out):
        bound = 1.0 / jnp.sqrt(jnp.float32(fan_in))
        w = jax.random.uniform(kw, (fan_in, fan_out), jnp.float32, -bound, bound)
        b = jax.random.uniform(kb, (1, fan_out), jnp.float32, -bound, bound)
        return w, b

    w1, b1 = lin(ks[0], ks[1], in_size, hid_size)     # GIN MLP layer 1
    w2, b2 = lin(ks[2], ks[3], hid_size, hid_size)    # GIN MLP layer 2
    wg1, bg1 = lin(ks[4], ks[5], hid_size, hid_size)  # GCNConv 2
    wg2, bg2 = lin(ks[6], ks[7], hid_size, hid_size)  # GCNConv 3
    wl, bl = lin(ks[8], ks[9], hid_size, out_size)    # final Linear
    return (w1, b1, w2, b2, wg1, bg1, wg2, bg2, wl, bl)


if __name__ == "__main__":
    N_NODES, IN_SIZE, HID_SIZE, OUT_SIZE = 16, 8, 32, 4

    key = jax.random.PRNGKey(0)
    kx, kp = jax.random.split(key)

    # deterministic node features
    x = jax.random.normal(kx, (N_NODES, IN_SIZE), jnp.float32)

    # deterministic bidirectional ring graph: i <-> (i+1) mod N
    idx = jnp.arange(N_NODES, dtype=jnp.int32)
    nxt = (idx + 1) % N_NODES
    src = jnp.concatenate([idx, nxt])
    dst = jnp.concatenate([nxt, idx])
    edge_index = jnp.stack([src, dst], axis=0)  # (2, 32)

    params = init_params(kp, IN_SIZE, HID_SIZE, OUT_SIZE)

    logp, emb = gin_forward(x, edge_index, params)
    jax.block_until_ready((logp, emb))

    assert logp.shape == (N_NODES, OUT_SIZE)
    assert emb.shape == (N_NODES, HID_SIZE)
    # each log_softmax row should sum (in prob space) to 1
    assert jnp.allclose(jnp.sum(jnp.exp(logp), axis=1), 1.0, atol=1e-4)

    # pure-JAX reference with the same bf16/f32 numerics
    logp_ref, emb_ref = gin_reference(x, edge_index, params)
    assert jnp.allclose(logp, logp_ref, atol=1e-3, rtol=1e-3)
    assert jnp.allclose(emb, emb_ref, atol=1e-3, rtol=1e-3)

    print("KERNEL_OK")
</pallas_src>

<mosaic_0001>
module attributes {stable_mosaic.version = 11 : i64} {
  func.func @gin_layer_kernel(%arg0: i32, %arg1: i32, %arg2: memref<128x128xbf16, #tpu.memory_space<vmem>>, %arg3: memref<128x128xbf16, #tpu.memory_space<vmem>>, %arg4: memref<128x128xbf16, #tpu.memory_space<vmem>>, %arg5: memref<1x128xf32, #tpu.memory_space<vmem>>, %arg6: memref<128x128xbf16, #tpu.memory_space<vmem>>, %arg7: memref<1x128xf32, #tpu.memory_space<vmem>>, %arg8: memref<128x128xbf16, #tpu.memory_space<vmem>>, %arg9: memref<128x128xbf16, #tpu.memory_space<vmem>>, %arg10: memref<128x128xf32, #tpu.memory_space<vmem>>) attributes {dimension_semantics = [#tpu.dimension_semantics<parallel>, #tpu.dimension_semantics<arbitrary>], iteration_bounds = array<i64: 1, 1>, scalar_prefetch = 0 : i64, scratch_operands = 1 : i64, tpu.core_type = #tpu.core_type<tc>, window_params = [{transform_indices = @transform_0, window_bounds = array<i64: 128, 128>}, {transform_indices = @transform_1, window_bounds = array<i64: 128, 128>}, {pipeline_mode = #tpu.pipeline_mode<synchronous>, transform_indices = @transform_2, window_bounds = array<i64: 128, 128>}, {pipeline_mode = #tpu.pipeline_mode<synchronous>, transform_indices = @transform_3, window_bounds = array<i64: 1, 128>}, {pipeline_mode = #tpu.pipeline_mode<synchronous>, transform_indices = @transform_4, window_bounds = array<i64: 128, 128>}, {pipeline_mode = #tpu.pipeline_mode<synchronous>, transform_indices = @transform_5, window_bounds = array<i64: 1, 128>}, {pipeline_mode = #tpu.pipeline_mode<synchronous>, transform_indices = @transform_6, window_bounds = array<i64: 128, 128>}, {transform_indices = @transform_7, window_bounds = array<i64: 128, 128>}]} {
    %c0_i32 = arith.constant 0 : i32
    %0 = arith.cmpi eq, %arg1, %c0_i32 : i32
    %1 = arith.extui %0 : i1 to i32
    %c0_i32_0 = arith.constant 0 : i32
    %2 = arith.cmpi ne, %1, %c0_i32_0 : i32
    scf.if %2 {
      %cst_10 = arith.constant 0.000000e+00 : f32
      %12 = vector.broadcast %cst_10 : f32 to vector<128x128xf32>
      %c0_11 = arith.constant 0 : index
      %c0_12 = arith.constant 0 : index
      %13 = vector.load %arg10[%c0_11, %c0_12] : memref<128x128xf32, #tpu.memory_space<vmem>>, vector<128x128xf32>
      tpu.vector_store %arg10[%c0_11, %c0_12], %12 {strides = array<i32>} : memref<128x128xf32, #tpu.memory_space<vmem>>, vector<128x128xf32>,
    } else {
    }
    %c0 = arith.constant 0 : index
    %c0_1 = arith.constant 0 : index
    %3 = vector.load %arg10[%c0, %c0_1] : memref<128x128xf32, #tpu.memory_space<vmem>>, vector<128x128xf32>
    %c0_2 = arith.constant 0 : index
    %c0_3 = arith.constant 0 : index
    %4 = vector.load %arg2[%c0_2, %c0_3] : memref<128x128xbf16, #tpu.memory_space<vmem>>, vector<128x128xbf16>
    %c0_4 = arith.constant 0 : index
    %c0_5 = arith.constant 0 : index
    %5 = vector.load %arg3[%c0_4, %c0_5] : memref<128x128xbf16, #tpu.memory_space<vmem>>, vector<128x128xbf16>
    %cst = arith.constant dense<0.000000e+00> : vector<128x128xf32>
    %6 = tpu.matmul %4, %5, %cst {dimension_numbers = #tpu.dot_dimension_numbers<[1], [0], [0], [1], [0, 0, 1, 1], [], []>} : vector<128x128xbf16>, vector<128x128xbf16>, vector<128x128xf32> -> vector<128x128xf32>
    %7 = arith.addf %3, %6 : vector<128x128xf32>
    %c0_6 = arith.constant 0 : index
    %c0_7 = arith.constant 0 : index
    %8 = vector.load %arg10[%c0_6, %c0_7] : memref<128x128xf32, #tpu.memory_space<vmem>>, vector<128x128xf32>
    tpu.vector_store %arg10[%c0_6, %c0_7], %7 {strides = array<i32>} : memref<128x128xf32, #tpu.memory_space<vmem>>, vector<128x128xf32>,
    %c0_i32_8 = arith.constant 0 : i32
    %9 = arith.cmpi eq, %arg1, %c0_i32_8 : i32
    %10 = arith.extui %9 : i1 to i32
    %c0_i32_9 = arith.constant 0 : i32
    %11 = arith.cmpi ne, %10, %c0_i32_9 : i32
    scf.if %11 {
      %c0_10 = arith.constant 0 : index
      %c0_11 = arith.constant 0 : index
      %12 = vector.load %arg10[%c0_10, %c0_11] : memref<128x128xf32, #tpu.memory_space<vmem>>, vector<128x128xf32>
      %13 = arith.truncf %12 : vector<128x128xf32> to vector<128x128xbf16>
      %c0_12 = arith.constant 0 : index
      %c0_13 = arith.constant 0 : index
      %14 = vector.load %arg4[%c0_12, %c0_13] : memref<128x128xbf16, #tpu.memory_space<vmem>>, vector<128x128xbf16>
      %cst_14 = arith.constant dense<0.000000e+00> : vector<128x128xf32>
      %15 = tpu.matmul %13, %14, %cst_14 {dimension_numbers = #tpu.dot_dimension_numbers<[1], [0], [0], [1], [0, 0, 1, 1], [], []>} : vector<128x128xbf16>, vector<128x128xbf16>, vector<128x128xf32> -> vector<128x128xf32>
      %c0_15 = arith.constant 0 : index
      %c0_16 = arith.constant 0 : index
      %16 = vector.load %arg5[%c0_15, %c0_16] : memref<1x128xf32, #tpu.memory_space<vmem>>, vector<1x128xf32>
      %17 = vector.broadcast %16 : vector<1x128xf32> to vector<128x128xf32>
      %18 = arith.addf %15, %17 : vector<128x128xf32>
      %cst_17 = arith.constant 0.000000e+00 : f32
      %19 = vector.broadcast %cst_17 : f32 to vector<128x128xf32>
      %20 = arith.maximumf %18, %19 : vector<128x128xf32>
      %21 = arith.truncf %20 : vector<128x128xf32> to vector<128x128xbf16>
      %c0_18 = arith.constant 0 : index
      %c0_19 = arith.constant 0 : index
      %22 = vector.load %arg6[%c0_18, %c0_19] : memref<128x128xbf16, #tpu.memory_space<vmem>>, vector<128x128xbf16>
      %cst_20 = arith.constant dense<0.000000e+00> : vector<128x128xf32>
      %23 = tpu.matmul %21, %22, %cst_20 {dimension_numbers = #tpu.dot_dimension_numbers<[1], [0], [0], [1], [0, 0, 1, 1], [], []>} : vector<128x128xbf16>, vector<128x128xbf16>, vector<128x128xf32> -> vector<128x128xf32>
      %c0_21 = arith.constant 0 : index
      %c0_22 = arith.constant 0 : index
      %24 = vector.load %arg7[%c0_21, %c0_22] : memref<1x128xf32, #tpu.memory_space<vmem>>, vector<1x128xf32>
      %25 = vector.broadcast %24 : vector<1x128xf32> to vector<128x128xf32>
      %26 = arith.addf %23, %25 : vector<128x128xf32>
      %cst_23 = arith.constant 0.000000e+00 : f32
      %27 = vector.broadcast %cst_23 : f32 to vector<128x128xf32>
      %28 = arith.maximumf %26, %27 : vector<128x128xf32>
      %29 = arith.truncf %28 : vector<128x128xf32> to vector<128x128xbf16>
      %c0_24 = arith.constant 0 : index
      %c0_25 = arith.constant 0 : index
      %30 = vector.load %arg8[%c0_24, %c0_25] : memref<128x128xbf16, #tpu.memory_space<vmem>>, vector<128x128xbf16>
      %cst_26 = arith.constant dense<0.000000e+00> : vector<128x128xf32>
      %31 = tpu.matmul %29, %30, %cst_26 {dimension_numbers = #tpu.dot_dimension_numbers<[1], [0], [0], [1], [0, 0, 1, 1], [], []>} : vector<128x128xbf16>, vector<128x128xbf16>, vector<128x128xf32> -> vector<128x128xf32>
      %32 = arith.truncf %31 : vector<128x128xf32> to vector<128x128xbf16>
      %c0_27 = arith.constant 0 : index
      %c0_28 = arith.constant 0 : index
      %33 = vector.load %arg9[%c0_27, %c0_28] : memref<128x128xbf16, #tpu.memory_space<vmem>>, vector<128x128xbf16>
      tpu.vector_store %arg9[%c0_27, %c0_28], %32 {strides = array<i32>} : memref<128x128xbf16, #tpu.memory_space<vmem>>, vector<128x128xbf16>,
    } else {
    }
    return
  }
  func.func @transform_0(%arg0: i32, %arg1: i32) -> (i32, i32) {
    %c0_i32 = arith.constant 0 : i32
    return %arg0, %arg1 : i32, i32
  }
  func.func @transform_1(%arg0: i32, %arg1: i32) -> (i32, i32) {
    %c0_i32 = arith.constant 0 : i32
    %c0_i32_0 = arith.constant 0 : i32
    return %arg1, %c0_i32 : i32, i32
  }
  func.func @transform_2(%arg0: i32, %arg1: i32) -> (i32, i32) {
    %c0_i32 = arith.constant 0 : i32
    %c0_i32_0 = arith.constant 0 : i32
    %c0_i32_1 = arith.constant 0 : i32
    return %c0_i32, %c0_i32_0 : i32, i32
  }
  func.func @transform_3(%arg0: i32, %arg1: i32) -> (i32, i32) {
    %c0_i32 = arith.constant 0 : i32
    %c0_i32_0 = arith.constant 0 : i32
    %c0_i32_1 = arith.constant 0 : i32
    return %c0_i32, %c0_i32_0 : i32, i32
  }
  func.func @transform_4(%arg0: i32, %arg1: i32) -> (i32, i32) {
    %c0_i32 = arith.constant 0 : i32
    %c0_i32_0 = arith.constant 0 : i32
    %c0_i32_1 = arith.constant 0 : i32
    return %c0_i32, %c0_i32_0 : i32, i32
  }
  func.func @transform_5(%arg0: i32, %arg1: i32) -> (i32, i32) {
    %c0_i32 = arith.constant 0 : i32
    %c0_i32_0 = arith.constant 0 : i32
    %c0_i32_1 = arith.constant 0 : i32
    return %c0_i32, %c0_i32_0 : i32, i32
  }
  func.func @transform_6(%arg0: i32, %arg1: i32) -> (i32, i32) {
    %c0_i32 = arith.constant 0 : i32
    %c0_i32_0 = arith.constant 0 : i32
    %c0_i32_1 = arith.constant 0 : i32
    return %c0_i32, %c0_i32_0 : i32, i32
  }
  func.func @transform_7(%arg0: i32, %arg1: i32) -> (i32, i32) {
    %c0_i32 = arith.constant 0 : i32
    %c0_i32_0 = arith.constant 0 : i32
    return %arg0, %c0_i32 : i32, i32
  }
}

</mosaic_0001>

<bundles_post_ra>
// kernel: tpu_custom_call.1
= control target key start
LH: loop header
LB: loop body
LE: loop exit
PB: predicated region body
PF: predicated region fallthrough
CT: control target
= control target key end

     0   :  { %12 = vsyncpa [#allocation4], 0  ;;  %s1719_s0 = inlined_call_operand.hbm [shape: bf16[128,128], index: 0, kind: input, shape index: {}]   ;;  %s1720_s1 = inlined_call_operand.hbm [shape: bf16[128,128], index: 1, kind: input, shape index: {}]   ;;  %s1721_s2 = inlined_call_operand.hbm [shape: bf16[128,128], index: 2, kind: input, shape index: {}]   ;;  %s1722_s3 = inlined_call_operand.vmem [shape: f32[1,128], index: 3, kind: input, shape index: {}]   ;;  %s1723_s4 = inlined_call_operand.hbm [shape: bf16[128,128], index: 4, kind: input, shape index: {}]   ;;  %s1724_s5 = inlined_call_operand.vmem [shape: f32[1,128], index: 5, kind: input, shape index: {}]   ;;  %s1725_s6 = inlined_call_operand.hbm [shape: bf16[128,128], index: 6, kind: input, shape index: {}]   ;;  %s1726_s7 = inlined_call_operand.hbm [shape: bf16[128,128], index: 7, kind: output, shape index: {}]  }
   0x1   :  { %13 = vsyncpa [#allocation7], 0 }
   0x2   :  { %14 = vsyncpa [#allocation10], 0 }
   0x3   :  { %15 = vsyncpa [#allocation5], 0  ;;  %s1561_s24 = smov [#allocation6]   ;;  %s1562_s26 = smov [#allocation9]  }
   0x4   :  { %s33_s25 = sshll.u32 %s1561_s24, 4  ;;  %s59_s27 = sshll.u32 %s1562_s26, 4  ;;  %s34_s25 = int_to_ptr.vmem [resolvable:$true] %s33_s25  ;;  %s1609_s27 = int_to_ptr.vmem [resolvable:$true] %s59_s27 }
   0x5   :  { %s1421_s30 = scalar_lea.hbm %s1720_s1, 1024 }
   0x6   :  { %p1422_p0 = scmp.ne.s32.totalorder %s1720_s1, %s1421_s30  ;;  %p1425_p1 = scmp.lt.u32.totalorder %s1421_s30, %s1720_s1 }
   0x8   :  { %p1427_p2 = pnand %p1425_p1, %p1422_p0 }
   0xa   :  { %1430 = shalt.err (!%p1427_p2)
}
   0xb   :  { %s1431_s12 = scalar_lea.vmem %s34_s25, 1024  ;;  %p1436_p4 = scmp.lt.s32.totalorder %s34_s25, %s34_s25 }
   0xc   :  { %p1432_p3 = scmp.ne.s32.totalorder %s34_s25, %s1431_s12  ;;  %p1437_p5 = scmp.lt.s32.totalorder %s1431_s12, %s1431_s12 }
   0xe   :  { %p1438_p6 = por %p1437_p5, %p1436_p4 }
  0x10   :  { %p1439_p7 = pnand %p1438_p6, %p1432_p3 }
  0x12   :  { %1442 = shalt.err (!%p1439_p7)
}
  0x13   :  { %s1563_s13 = smov 64   ;;  %s1564_s14 = smov 4  }
  0x14   :  { %39 = dma.hbm_to_vmem [thread:$0]  %s1720_s1, 1024, %s34_s25, [#allocation7], %s1563_s13, %s1563_s13, %s1564_s14  }
  0x15   :  { %s1443_s19 = scalar_lea.hbm %s1723_s4, 1024 }
  0x16   :  { %p1444_p8 = scmp.ne.s32.totalorder %s1723_s4, %s1443_s19  ;;  %p1447_p9 = scmp.lt.u32.totalorder %s1443_s19, %s1723_s4 }
  0x18   :  { %p1449_p10 = pnand %p1447_p9, %p1444_p8 }
  0x1a   :  { %1452 = shalt.err (!%p1449_p10)
}
  0x1b   :  { %s1453_s24 = scalar_lea.vmem %s1609_s27, 1024  ;;  %p1458_p12 = scmp.lt.s32.totalorder %s1609_s27, %s1609_s27 }
  0x1c   :  { %p1454_p11 = scmp.ne.s32.totalorder %s1609_s27, %s1453_s24  ;;  %p1459_p13 = scmp.lt.s32.totalorder %s1453_s24, %s1453_s24 }
  0x1e   :  { %p1460_p0 = por %p1459_p13, %p1458_p12 }
  0x20   :  { %p1461_p1 = pnand %p1460_p0, %p1454_p11 }
  0x22   :  { %1464 = shalt.err (!%p1461_p1)
}
  0x23   :  { %65 = dma.hbm_to_vmem [thread:$0]  %s1723_s4, 1024, %s1609_s27, [#allocation10], %s1563_s13, %s1563_s13, %s1564_s14  }
  0x24   :  { %s1565_s26 = smov [#allocation3]   ;;  %s1566_s29 = smov [#allocation8]  }
  0x25   :  { %s21_s28 = sshll.u32 %s1565_s26, 4  ;;  %s45_s30 = sshll.u32 %s1566_s29, 4  ;;  %s22_s28 = int_to_ptr.vmem [resolvable:$true] %s21_s28  ;;  %s1646_s30 = int_to_ptr.vmem [resolvable:$true] %s45_s30 }
  0x26   :  { %s1465_s10 = scalar_lea.hbm %s1719_s0, 1024 }
  0x27   :  { %p1466_p2 = scmp.ne.s32.totalorder %s1719_s0, %s1465_s10  ;;  %p1469_p3 = scmp.lt.u32.totalorder %s1465_s10, %s1719_s0 }
  0x29   :  { %p1471_p4 = pnand %p1469_p3, %p1466_p2 }
  0x2b   :  { %1474 = shalt.err (!%p1471_p4)
}
  0x2c   :  { %s1475_s4 = scalar_lea.vmem %s22_s28, 1024  ;;  %p1480_p6 = scmp.lt.s32.totalorder %s22_s28, %s22_s28 }
  0x2d   :  { %p1476_p5 = scmp.ne.s32.totalorder %s22_s28, %s1475_s4  ;;  %p1481_p7 = scmp.lt.s32.totalorder %s1475_s4, %s1475_s4 }
  0x2f   :  { %p1482_p8 = por %p1481_p7, %p1480_p6 }
  0x31   :  { %p1483_p9 = pnand %p1482_p8, %p1476_p5 }
  0x33   :  { %1486 = shalt.err (!%p1483_p9)
}
  0x34   :  { %27 = dma.hbm_to_vmem [thread:$0]  %s1719_s0, 1024, %s22_s28, [#allocation4], %s1563_s13, %s1563_s13, %s1564_s14  }
  0x35   :  { %s1487_s20 = scalar_lea.hbm %s1721_s2, 1024 }
  0x36   :  { %p1488_p10 = scmp.ne.s32.totalorder %s1721_s2, %s1487_s20  ;;  %p1491_p11 = scmp.lt.u32.totalorder %s1487_s20, %s1721_s2 }
  0x38   :  { %p1493_p12 = pnand %p1491_p11, %p1488_p10 }
  0x3a   :  { %1496 = shalt.err (!%p1493_p12)
}
  0x3b   :  { %s1497_s1 = scalar_lea.vmem %s1646_s30, 1024  ;;  %p1502_p0 = scmp.lt.s32.totalorder %s1646_s30, %s1646_s30 }
  0x3c   :  { %p1498_p13 = scmp.ne.s32.totalorder %s1646_s30, %s1497_s1  ;;  %p1503_p1 = scmp.lt.s32.totalorder %s1497_s1, %s1497_s1 }
  0x3e   :  { %p1504_p2 = por %p1503_p1, %p1502_p0 }
  0x40   :  { %p1505_p3 = pnand %p1504_p2, %p1498_p13 }
  0x42   :  { %1508 = shalt.err (!%p1505_p3)
}
  0x43   :  { %51 = dma.hbm_to_vmem [thread:$0]  %s1721_s2, 1024, %s1646_s30, [#allocation7], %s1563_s13, %s1563_s13, %s1564_s14  }
  0x44   :  { %s1567_s26 = smov [#allocation11]   ;;  %s1509_s9 = scalar_lea.hbm %s1725_s6, 1024 }
  0x45   :  { %s73_s28 = sshll.u32 %s1567_s26, 4  ;;  %p1510_p4 = scmp.ne.s32.totalorder %s1725_s6, %s1509_s9  ;;  %s74_s28 = int_to_ptr.vmem [resolvable:$true] %s73_s28 }
  0x46   :  { %p1513_p5 = scmp.lt.u32.totalorder %s1509_s9, %s1725_s6 }
  0x48   :  { %p1515_p6 = pnand %p1513_p5, %p1510_p4 }
  0x4a   :  { %1518 = shalt.err (!%p1515_p6)
}
  0x4b   :  { %s1519_s16 = scalar_lea.vmem %s74_s28, 1024  ;;  %p1524_p8 = scmp.lt.s32.totalorder %s74_s28, %s74_s28 }
  0x4c   :  { %p1520_p7 = scmp.ne.s32.totalorder %s74_s28, %s1519_s16  ;;  %p1525_p9 = scmp.lt.s32.totalorder %s1519_s16, %s1519_s16 }
  0x4e   :  { %p1526_p10 = por %p1525_p9, %p1524_p8 }
  0x50   :  { %p1527_p11 = pnand %p1526_p10, %p1520_p7 }
  0x52   :  { %1530 = shalt.err (!%p1527_p11)
}
  0x53   :  { %79 = dma.hbm_to_vmem [thread:$0]  %s1725_s6, 1024, %s74_s28, [#allocation10], %s1563_s13, %s1563_s13, %s1564_s14  }
  0x54   :  { %1553 = dma.done.wait [#allocation4], 1024  }
  0x55   :  { %1554 = vsyncadd [#allocation4], 4294966272 }
  0x56   :  { %1555 = dma.done.wait [#allocation7], 2048  }
  0x57   :  { %1556 = vsyncadd [#allocation7], 4294965248 }
  0x58   :  { %1557 = dma.done.wait [#allocation10], 2048  }
  0x59   :  { %1558 = vsyncadd [#allocation10], 4294965248  ;;  %v1381_v0 = vld [vmem:[#allocation6] sm:$0xff]   ;;  %v1382_v1 = vld [vmem:[#allocation6 + $0x8] sm:$0xff]  }
  0x5a   :  { %1245 = vmatprep.subr.bf16.mxu0 %v1381_v0  ;;  %v1383_v2 = vld [vmem:[#allocation6 + $0x10] sm:$0xff]   ;;  %v1384_v3 = vld [vmem:[#allocation6 + $0x18] sm:$0xff]   ;;  %v1389_v4 = vld [vmem:[#allocation3] sm:$0xff]  }
  0x5b   :  { %1246 = vmatpush3.bf16.msra.mxu0 %v1381_v0  ;;  %1261 = vmatprep.mubr.bf16.mxu0 %v1389_v4  ;;  %v1385_v5 = vld [vmem:[#allocation6 + $0x20] sm:$0xff]   ;;  %v1386_v6 = vld [vmem:[#allocation6 + $0x28] sm:$0xff]   ;;  %v1387_v9 = vld [vmem:[#allocation6 + $0x30] sm:$0xff]  }
  0x5c   :  { %1247 = vmatprep.subr.bf16.mxu0 %v1382_v1  ;;  %v1397_v7 = vld [vmem:[#allocation8] sm:$0xff]   ;;  %v1398_v8 = vld [vmem:[#allocation8 + $0x8] sm:$0xff]   ;;  %v1399_v10 = vld [vmem:[#allocation8 + $0x10] sm:$0xff]  }
  0x5d   :  { %1277 = vmatprep.subr.bf16.mxu1 %v1397_v7  ;;  %v1388_v11 = vld [vmem:[#allocation6 + $0x38] sm:$0xff]   ;;  %v1401_v13 = vld [vmem:[#allocation8 + $0x20] sm:$0xff]   ;;  %v1390_v14 = vld [vmem:[#allocation3 + $0x8] sm:$0xff]  }
  0x5e   :  { %1278 = vmatpush3.bf16.msra.mxu1 %v1397_v7  ;;  %v1400_v12 = vld [vmem:[#allocation8 + $0x18] sm:$0xff]   ;;  %v1391_v15 = vld [vmem:[#allocation3 + $0x10] sm:$0xff]   ;;  %v1402_v16 = vld [vmem:[#allocation8 + $0x28] sm:$0xff]  }
  0x5f   :  { %1248 = vmatpush3.bf16.msra.mxu0 %v1382_v1  ;;  %1279 = vmatprep.subr.bf16.mxu1 %v1398_v8  ;;  %v1403_v17 = vld [vmem:[#allocation8 + $0x30] sm:$0xff]   ;;  %v1392_v18 = vld [vmem:[#allocation3 + $0x18] sm:$0xff]   ;;  %v1393_v19 = vld [vmem:[#allocation3 + $0x20] sm:$0xff]  }
  0x60   :  { %1249 = vmatprep.subr.bf16.mxu0 %v1383_v2  ;;  %v1394_v20 = vld [vmem:[#allocation3 + $0x28] sm:$0xff]   ;;  %v1395_v21 = vld [vmem:[#allocation3 + $0x30] sm:$0xff]   ;;  %v1396_v22 = vld [vmem:[#allocation3 + $0x38] sm:$0xff]  }
  0x61   :  { %v1404_v23 = vld [vmem:[#allocation8 + $0x38] sm:$0xff]   ;;  %v1405_v24 = vld [vmem:[#allocation9] sm:$0xff]   ;;  %v1406_v25 = vld [vmem:[#allocation9 + $0x8] sm:$0xff]  }
  0x62   :  { %1280 = vmatpush3.bf16.msra.mxu1 %v1398_v8  ;;  %v1407_v26 = vld [vmem:[#allocation9 + $0x10] sm:$0xff]   ;;  %v1408_v27 = vld [vmem:[#allocation9 + $0x18] sm:$0xff]   ;;  %v1409_v28 = vld [vmem:[#allocation9 + $0x20] sm:$0xff]  }
  0x63   :  { %1250 = vmatpush3.bf16.msra.mxu0 %v1383_v2  ;;  %1281 = vmatprep.subr.bf16.mxu1 %v1399_v10  ;;  %v1410_v29 = vld [vmem:[#allocation9 + $0x28] sm:$0xff]   ;;  %v1411_v54 = vld [vmem:[#allocation9 + $0x30] sm:$0xff]   ;;  %v1412_v55 = vld [vmem:[#allocation9 + $0x38] sm:$0xff]  }
  0x64   :  { %1251 = vmatprep.subr.bf16.mxu0 %v1384_v3  ;;  %v1413_v56 = vld [vmem:[#allocation11] sm:$0xff]   ;;  %v1414_v57 = vld [vmem:[#allocation11 + $0x8] sm:$0xff]   ;;  %v1415_v58 = vld [vmem:[#allocation11 + $0x10] sm:$0xff]  }
  0x65   :  { %v1416_v59 = vld [vmem:[#allocation11 + $0x18] sm:$0xff]   ;;  %v1417_v60 = vld [vmem:[#allocation11 + $0x20] sm:$0xff]   ;;  %v1418_v61 = vld [vmem:[#allocation11 + $0x28] sm:$0xff]  }
  0x66   :  { %1282 = vmatpush3.bf16.msra.mxu1 %v1399_v10  ;;  %v1076_v62 = vld [vmem:[%s1722_s3] ss:$0 sm:$0xff] }
  0x67   :  { %1252 = vmatpush3.bf16.msra.mxu0 %v1384_v3  ;;  %1283 = vmatprep.subr.bf16.mxu1 %v1400_v12 }
  0x68   :  { %1253 = vmatprep.subr.bf16.mxu0 %v1385_v5 }
  0x6a   :  { %1284 = vmatpush3.bf16.msra.mxu1 %v1400_v12 }
  0x6b   :  { %1254 = vmatpush3.bf16.msra.mxu0 %v1385_v5  ;;  %1285 = vmatprep.subr.bf16.mxu1 %v1401_v13 }
  0x6c   :  { %1255 = vmatprep.subr.bf16.mxu0 %v1386_v6 }
  0x6e   :  { %1286 = vmatpush3.bf16.msra.mxu1 %v1401_v13 }
  0x6f   :  { %1256 = vmatpush3.bf16.msra.mxu0 %v1386_v6  ;;  %1287 = vmatprep.subr.bf16.mxu1 %v1402_v16 }
  0x70   :  { %1257 = vmatprep.subr.bf16.mxu0 %v1387_v9 }
  0x72   :  { %1288 = vmatpush3.bf16.msra.mxu1 %v1402_v16 }
  0x73   :  { %1258 = vmatpush3.bf16.msra.mxu0 %v1387_v9  ;;  %1289 = vmatprep.subr.bf16.mxu1 %v1403_v17 }
  0x74   :  { %1259 = vmatprep.subr.bf16.mxu0 %v1388_v11 }
  0x76   :  { %1290 = vmatpush3.bf16.msra.mxu1 %v1403_v17 }
  0x77   :  { %1260 = vmatpush3.bf16.msra.mxu0 %v1388_v11  ;;  %1291 = vmatprep.subr.bf16.mxu1 %v1404_v23 }
  0x78   :  { %1309 = vmatprep.subr.bf16.mxu0 %v1405_v24 }
  0x7a   :  { %1262 = vmatmul.mubr.bf16.vlgmr.msra.gmra.mrb[0].mxu0 %v1390_v14  ;;  %1292 = vmatpush3.bf16.msra.mxu1 %v1404_v23 }
  0x7b   :  { %1265 = vmatprep.mubr.bf16.mxu0 %v1391_v15  ;;  %1310 = vmatpush3.bf16.msra.mxu0 %v1405_v24 }
  0x7c   :  { %1311 = vmatprep.subr.bf16.mxu0 %v1406_v25  ;;  %1341 = vmatprep.subr.bf16.mxu1 %v1413_v56 }
  0x7f   :  { %1312 = vmatpush3.bf16.msra.mxu0 %v1406_v25 }
  0x80   :  { %1313 = vmatprep.subr.bf16.mxu0 %v1407_v26 }
  0x82   :  { %1266 = vmatmul.mubr.bf16.gmra.mrb[4].mxu0 %v1392_v18 }
  0x83   :  { %1269 = vmatprep.mubr.bf16.mxu0 %v1393_v19  ;;  %1314 = vmatpush3.bf16.msra.mxu0 %v1407_v26 }
  0x84   :  { %1315 = vmatprep.subr.bf16.mxu0 %v1408_v27 }
  0x87   :  { %1316 = vmatpush3.bf16.msra.mxu0 %v1408_v27 }
  0x88   :  { %1317 = vmatprep.subr.bf16.mxu0 %v1409_v28 }
  0x8a   :  { %1270 = vmatmul.mubr.bf16.gmra.mrb[8].mxu0 %v1394_v20 }
  0x8b   :  { %1273 = vmatprep.mubr.bf16.mxu0 %v1395_v21  ;;  %1318 = vmatpush3.bf16.msra.mxu0 %v1409_v28 }
  0x8c   :  { %1319 = vmatprep.subr.bf16.mxu0 %v1410_v29 }
  0x8f   :  { %1320 = vmatpush3.bf16.msra.mxu0 %v1410_v29 }
  0x90   :  { %1321 = vmatprep.subr.bf16.mxu0 %v1411_v54 }
  0x92   :  { %1274 = vmatmul.mubr.bf16.gmra.mrb[12].mxu0 %v1396_v22 }
  0x93   :  { %1322 = vmatpush3.bf16.msra.mxu0 %v1411_v54 }
  0x94   :  { %1323 = vmatprep.subr.bf16.mxu0 %v1412_v55 }
  0x97   :  { %1324 = vmatpush3.bf16.msra.mxu0 %v1412_v55  ;;  %v1419_v55 = vld [vmem:[#allocation11 + $0x30] sm:$0xff]  }
 0x14d   :  { %v1263_v30 = vpop.f32.mrb[0].mxu0 }
 0x14e   :  { %v294_v31 = vpop.f32.mrb[1].mxu0 }
 0x14f   :  { %v1264_v32 = vpop.f32.mrb[2].mxu0 }
 0x150   :  { %v409_v33 = vpack.c.bf16 %v1264_v32, %v1263_v30  ;;  %v297_v34 = vpop.f32.mrb[3].mxu0 }
 0x151   :  { %v408_v35 = vpack.c.bf16 %v297_v34, %v294_v31 }
 0x153   :  { %1293 = vmatprep.mubr.bf16.mxu1 %v408_v35 }
 0x154   :  { %1294 = vmatmul.mubr.bf16.vlgmr.msra.gmra.mrb[0].mxu1 %v409_v33 }
 0x155   :  { %v1267_v36 = vpop.f32.mrb[4].mxu0  ;;  %1342 = vmatpush3.bf16.msra.mxu1 %v1413_v56  ;;  %v1420_v56 = vld [vmem:[#allocation11 + $0x38] sm:$0xff]  }
 0x156   :  { %v310_v37 = vpop.f32.mrb[5].mxu0  ;;  %1343 = vmatprep.subr.bf16.mxu1 %v1414_v57 }
 0x157   :  { %v1268_v38 = vpop.f32.mrb[6].mxu0 }
 0x158   :  { %v411_v39 = vpack.c.bf16 %v1268_v38, %v1267_v36  ;;  %v313_v40 = vpop.f32.mrb[7].mxu0 }
 0x159   :  { %v410_v41 = vpack.c.bf16 %v313_v40, %v310_v37  ;;  %1344 = vmatpush3.bf16.msra.mxu1 %v1414_v57  ;;  %v1085_v57 = vld [vmem:[%s1724_s5] ss:$0 sm:$0xff]  ;;  %s1568_s5 = smov [#allocation12]  }
 0x15a   :  { %1345 = vmatprep.subr.bf16.mxu1 %v1415_v58  ;;  %s1046_s17 = sshll.u32 %s1568_s5, 4  ;;  %s1047_s17 = int_to_ptr.vmem [resolvable:$true] %s1046_s17 }
 0x15b   :  { %1297 = vmatprep.mubr.bf16.mxu1 %v410_v41  ;;  %s1531_s18 = scalar_lea.vmem %s1047_s17, 1024  ;;  %p1536_p13 = scmp.lt.s32.totalorder %s1047_s17, %s1047_s17 }
 0x15c   :  { %1298 = vmatmul.mubr.bf16.gmra.mrb[4].mxu1 %v411_v39  ;;  %p1532_p12 = scmp.ne.s32.totalorder %s1047_s17, %s1531_s18  ;;  %p1537_p0 = scmp.lt.s32.totalorder %s1531_s18, %s1531_s18 }
 0x15d   :  { %v1271_v42 = vpop.f32.mrb[8].mxu0  ;;  %1346 = vmatpush3.bf16.msra.mxu1 %v1415_v58 }
 0x15e   :  { %v326_v43 = vpop.f32.mrb[9].mxu0  ;;  %1347 = vmatprep.subr.bf16.mxu1 %v1416_v59  ;;  %p1538_p1 = por %p1537_p0, %p1536_p13 }
 0x15f   :  { %v1272_v44 = vpop.f32.mrb[10].mxu0 }
 0x160   :  { %v413_v45 = vpack.c.bf16 %v1272_v44, %v1271_v42  ;;  %v329_v46 = vpop.f32.mrb[11].mxu0  ;;  %p1539_p2 = pnand %p1538_p1, %p1532_p12 }
 0x161   :  { %v412_v47 = vpack.c.bf16 %v329_v46, %v326_v43  ;;  %1348 = vmatpush3.bf16.msra.mxu1 %v1416_v59 }
 0x162   :  { %1349 = vmatprep.subr.bf16.mxu1 %v1417_v60 }
 0x163   :  { %1301 = vmatprep.mubr.bf16.mxu1 %v412_v47 }
 0x164   :  { %1302 = vmatmul.mubr.bf16.gmra.mrb[8].mxu1 %v413_v45 }
 0x165   :  { %v1275_v48 = vpop.f32.mrb[12].mxu0  ;;  %1350 = vmatpush3.bf16.msra.mxu1 %v1417_v60 }
 0x166   :  { %v342_v49 = vpop.f32.mrb[13].mxu0  ;;  %1351 = vmatprep.subr.bf16.mxu1 %v1418_v61 }
 0x167   :  { %v1276_v50 = vpop.f32.mrb[14].mxu0 }
 0x168   :  { %v415_v51 = vpack.c.bf16 %v1276_v50, %v1275_v48  ;;  %v345_v52 = vpop.f32.mrb[15].mxu0 }
 0x169   :  { %v414_v53 = vpack.c.bf16 %v345_v52, %v342_v49  ;;  %1352 = vmatpush3.bf16.msra.mxu1 %v1418_v61 }
 0x16a   :  { %1353 = vmatprep.subr.bf16.mxu1 %v1419_v55 }
 0x16b   :  { %1305 = vmatprep.mubr.bf16.mxu1 %v414_v53 }
 0x16c   :  { %1306 = vmatmul.mubr.bf16.gmra.mrb[12].mxu1 %v415_v51 }
 0x16d   :  { %1354 = vmatpush3.bf16.msra.mxu1 %v1419_v55 }
 0x16e   :  { %1355 = vmatprep.subr.bf16.mxu1 %v1420_v56 }
 0x171   :  { %1356 = vmatpush3.bf16.msra.mxu1 %v1420_v56 }
 0x227   :  { %v1295_v63 = vpop.f32.mrb[0].mxu1 }
 0x228   :  { %v530_v0 = vadd.f32 %v1295_v63, %v1076_v62  ;;  %v521_v1 = vpop.f32.mrb[1].mxu1 }
 0x229   :  { %v522_v2 = vadd.f32 %v1076_v62, %v521_v1  ;;  %v1296_v3 = vpop.f32.mrb[2].mxu1 }
 0x22a   :  { %v533_v4 = vadd.f32 %v1296_v3, %v1076_v62  ;;  %v524_v5 = vpop.f32.mrb[3].mxu1  ;;  %v586_v7 = vmax.f32 %v530_v0, 0.0 }
 0x22b   :  { %v525_v6 = vadd.f32 %v1076_v62, %v524_v5  ;;  %v584_v9 = vmax.f32 %v522_v2, 0.0 }
 0x22c   :  { %v587_v8 = vmax.f32 %v533_v4, 0.0 }
 0x22d   :  { %v585_v10 = vmax.f32 %v525_v6, 0.0 }
 0x22e   :  { %v601_v11 = vpack.c.bf16 %v587_v8, %v586_v7 }
 0x22f   :  { %v600_v12 = vpack.c.bf16 %v585_v10, %v584_v9  ;;  %v1299_v13 = vpop.f32.mrb[4].mxu1 }
 0x230   :  { %v546_v14 = vadd.f32 %v1299_v13, %v1076_v62  ;;  %v537_v15 = vpop.f32.mrb[5].mxu1 }
 0x231   :  { %v538_v16 = vadd.f32 %v1076_v62, %v537_v15  ;;  %v1300_v17 = vpop.f32.mrb[6].mxu1  ;;  %1325 = vmatprep.mubr.bf16.mxu0 %v600_v12 }
 0x232   :  { %v549_v18 = vadd.f32 %v1300_v17, %v1076_v62  ;;  %v540_v19 = vpop.f32.mrb[7].mxu1  ;;  %1326 = vmatmul.mubr.bf16.vlgmr.msra.gmra.mrb[16].mxu0 %v601_v11  ;;  %v590_v21 = vmax.f32 %v546_v14, 0.0 }
 0x233   :  { %v541_v20 = vadd.f32 %v1076_v62, %v540_v19  ;;  %v588_v23 = vmax.f32 %v538_v16, 0.0 }
 0x234   :  { %v591_v22 = vmax.f32 %v549_v18, 0.0 }
 0x235   :  { %v589_v24 = vmax.f32 %v541_v20, 0.0 }
 0x236   :  { %v603_v25 = vpack.c.bf16 %v591_v22, %v590_v21 }
 0x237   :  { %v602_v26 = vpack.c.bf16 %v589_v24, %v588_v23  ;;  %v1303_v27 = vpop.f32.mrb[8].mxu1 }
 0x238   :  { %v562_v28 = vadd.f32 %v1303_v27, %v1076_v62  ;;  %v553_v29 = vpop.f32.mrb[9].mxu1 }
 0x239   :  { %v554_v30 = vadd.f32 %v1076_v62, %v553_v29  ;;  %v1304_v31 = vpop.f32.mrb[10].mxu1  ;;  %1329 = vmatprep.mubr.bf16.mxu0 %v602_v26 }
 0x23a   :  { %v565_v32 = vadd.f32 %v1304_v31, %v1076_v62  ;;  %v556_v33 = vpop.f32.mrb[11].mxu1  ;;  %1330 = vmatmul.mubr.bf16.gmra.mrb[20].mxu0 %v603_v25  ;;  %v594_v35 = vmax.f32 %v562_v28, 0.0 }
 0x23b   :  { %v557_v34 = vadd.f32 %v1076_v62, %v556_v33  ;;  %v592_v37 = vmax.f32 %v554_v30, 0.0 }
 0x23c   :  { %v595_v36 = vmax.f32 %v565_v32, 0.0 }
 0x23d   :  { %v593_v38 = vmax.f32 %v557_v34, 0.0 }
 0x23e   :  { %v605_v39 = vpack.c.bf16 %v595_v36, %v594_v35 }
 0x23f   :  { %v604_v40 = vpack.c.bf16 %v593_v38, %v592_v37  ;;  %v1307_v41 = vpop.f32.mrb[12].mxu1 }
 0x240   :  { %v578_v42 = vadd.f32 %v1307_v41, %v1076_v62  ;;  %v569_v43 = vpop.f32.mrb[13].mxu1 }
 0x241   :  { %v570_v44 = vadd.f32 %v1076_v62, %v569_v43  ;;  %v1308_v45 = vpop.f32.mrb[14].mxu1  ;;  %1333 = vmatprep.mubr.bf16.mxu0 %v604_v40 }
 0x242   :  { %v581_v46 = vadd.f32 %v1308_v45, %v1076_v62  ;;  %v572_v47 = vpop.f32.mrb[15].mxu1  ;;  %1334 = vmatmul.mubr.bf16.gmra.mrb[24].mxu0 %v605_v39  ;;  %v598_v49 = vmax.f32 %v578_v42, 0.0 }
 0x243   :  { %v573_v48 = vadd.f32 %v1076_v62, %v572_v47  ;;  %v596_v51 = vmax.f32 %v570_v44, 0.0 }
 0x244   :  { %v599_v50 = vmax.f32 %v581_v46, 0.0 }
 0x245   :  { %v597_v52 = vmax.f32 %v573_v48, 0.0 }
 0x246   :  { %v607_v53 = vpack.c.bf16 %v599_v50, %v598_v49 }
 0x247   :  { %v606_v54 = vpack.c.bf16 %v597_v52, %v596_v51 }
 0x249   :  { %1337 = vmatprep.mubr.bf16.mxu0 %v606_v54 }
 0x24a   :  { %1338 = vmatmul.mubr.bf16.gmra.mrb[28].mxu0 %v607_v53 }
 0x305   :  { %v1327_v58 = vpop.f32.mrb[16].mxu0 }
 0x306   :  { %v722_v59 = vadd.f32 %v1327_v58, %v1085_v57  ;;  %v713_v60 = vpop.f32.mrb[17].mxu0 }
 0x307   :  { %v714_v61 = vadd.f32 %v1085_v57, %v713_v60  ;;  %v1328_v62 = vpop.f32.mrb[18].mxu0 }
 0x308   :  { %v725_v63 = vadd.f32 %v1328_v62, %v1085_v57  ;;  %v716_v0 = vpop.f32.mrb[19].mxu0  ;;  %v778_v2 = vmax.f32 %v722_v59, 0.0 }
 0x309   :  { %v717_v1 = vadd.f32 %v1085_v57, %v716_v0  ;;  %v776_v4 = vmax.f32 %v714_v61, 0.0 }
 0x30a   :  { %v779_v3 = vmax.f32 %v725_v63, 0.0 }
 0x30b   :  { %v777_v5 = vmax.f32 %v717_v1, 0.0 }
 0x30c   :  { %v793_v6 = vpack.c.bf16 %v779_v3, %v778_v2 }
 0x30d   :  { %v792_v7 = vpack.c.bf16 %v777_v5, %v776_v4  ;;  %v1331_v8 = vpop.f32.mrb[20].mxu0 }
 0x30e   :  { %v738_v9 = vadd.f32 %v1331_v8, %v1085_v57  ;;  %v729_v10 = vpop.f32.mrb[21].mxu0 }
 0x30f   :  { %v730_v11 = vadd.f32 %v1085_v57, %v729_v10  ;;  %v1332_v12 = vpop.f32.mrb[22].mxu0  ;;  %1357 = vmatprep.mubr.bf16.mxu1 %v792_v7 }
 0x310   :  { %v741_v13 = vadd.f32 %v1332_v12, %v1085_v57  ;;  %v732_v14 = vpop.f32.mrb[23].mxu0  ;;  %1358 = vmatmul.mubr.bf16.vlgmr.msra.gmra.mrb[16].mxu1 %v793_v6  ;;  %v782_v16 = vmax.f32 %v738_v9, 0.0 }
 0x311   :  { %v733_v15 = vadd.f32 %v1085_v57, %v732_v14  ;;  %v780_v18 = vmax.f32 %v730_v11, 0.0 }
 0x312   :  { %v783_v17 = vmax.f32 %v741_v13, 0.0 }
 0x313   :  { %v781_v19 = vmax.f32 %v733_v15, 0.0 }
 0x314   :  { %v795_v20 = vpack.c.bf16 %v783_v17, %v782_v16 }
 0x315   :  { %v794_v21 = vpack.c.bf16 %v781_v19, %v780_v18  ;;  %v1335_v22 = vpop.f32.mrb[24].mxu0 }
 0x316   :  { %v754_v23 = vadd.f32 %v1335_v22, %v1085_v57  ;;  %v745_v24 = vpop.f32.mrb[25].mxu0 }
 0x317   :  { %v746_v25 = vadd.f32 %v1085_v57, %v745_v24  ;;  %v1336_v26 = vpop.f32.mrb[26].mxu0  ;;  %1361 = vmatprep.mubr.bf16.mxu1 %v794_v21 }
 0x318   :  { %v757_v27 = vadd.f32 %v1336_v26, %v1085_v57  ;;  %v748_v28 = vpop.f32.mrb[27].mxu0  ;;  %1362 = vmatmul.mubr.bf16.gmra.mrb[20].mxu1 %v795_v20  ;;  %v786_v30 = vmax.f32 %v754_v23, 0.0 }
 0x319   :  { %v749_v29 = vadd.f32 %v1085_v57, %v748_v28  ;;  %v784_v32 = vmax.f32 %v746_v25, 0.0 }
 0x31a   :  { %v787_v31 = vmax.f32 %v757_v27, 0.0 }
 0x31b   :  { %v785_v33 = vmax.f32 %v749_v29, 0.0 }
 0x31c   :  { %v797_v34 = vpack.c.bf16 %v787_v31, %v786_v30 }
 0x31d   :  { %v796_v35 = vpack.c.bf16 %v785_v33, %v784_v32  ;;  %v1339_v36 = vpop.f32.mrb[28].mxu0 }
 0x31e   :  { %v770_v37 = vadd.f32 %v1339_v36, %v1085_v57  ;;  %v761_v38 = vpop.f32.mrb[29].mxu0 }
 0x31f   :  { %v762_v39 = vadd.f32 %v1085_v57, %v761_v38  ;;  %v1340_v40 = vpop.f32.mrb[30].mxu0  ;;  %1365 = vmatprep.mubr.bf16.mxu1 %v796_v35 }
 0x320   :  { %v773_v41 = vadd.f32 %v1340_v40, %v1085_v57  ;;  %v764_v42 = vpop.f32.mrb[31].mxu0  ;;  %1366 = vmatmul.mubr.bf16.gmra.mrb[24].mxu1 %v797_v34  ;;  %v790_v44 = vmax.f32 %v770_v37, 0.0 }
 0x321   :  { %v765_v43 = vadd.f32 %v1085_v57, %v764_v42  ;;  %v788_v46 = vmax.f32 %v762_v39, 0.0 }
 0x322   :  { %v791_v45 = vmax.f32 %v773_v41, 0.0 }
 0x323   :  { %v789_v47 = vmax.f32 %v765_v43, 0.0 }
 0x324   :  { %v799_v48 = vpack.c.bf16 %v791_v45, %v790_v44 }
 0x325   :  { %v798_v49 = vpack.c.bf16 %v789_v47, %v788_v46 }
 0x327   :  { %1369 = vmatprep.mubr.bf16.mxu1 %v798_v49 }
 0x328   :  { %1370 = vmatmul.mubr.bf16.gmra.mrb[28].mxu1 %v799_v48 }
 0x3e3   :  { %v1359_v50 = vpop.f32.mrb[16].mxu1 }
 0x3e4   :  { %v898_v51 = vpop.f32.mrb[17].mxu1 }
 0x3e5   :  { %v1360_v52 = vpop.f32.mrb[18].mxu1 }
 0x3e6   :  { %v1142_v53 = vpack.c.bf16 %v1360_v52, %v1359_v50  ;;  %v901_v54 = vpop.f32.mrb[19].mxu1 }
 0x3e7   :  { %v1137_v55 = vpack.c.bf16 %v901_v54, %v898_v51 }
 0x3e8   :  { %1174 = vst [vmem:[#allocation12 + $0x8] sm:$0xff] %v1142_v53  }
 0x3e9   :  { %1138 = vst [vmem:[#allocation12] sm:$0xff] %v1137_v55  }
 0x3eb   :  { %v1363_v56 = vpop.f32.mrb[20].mxu1 }
 0x3ec   :  { %v914_v58 = vpop.f32.mrb[21].mxu1 }
 0x3ed   :  { %v1364_v59 = vpop.f32.mrb[22].mxu1 }
 0x3ee   :  { %v1152_v57 = vpack.c.bf16 %v1364_v59, %v1363_v56  ;;  %v917_v60 = vpop.f32.mrb[23].mxu1 }
 0x3ef   :  { %v1147_v61 = vpack.c.bf16 %v917_v60, %v914_v58 }
 0x3f0   :  { %1176 = vst [vmem:[#allocation12 + $0x18] sm:$0xff] %v1152_v57  }
 0x3f1   :  { %1175 = vst [vmem:[#allocation12 + $0x10] sm:$0xff] %v1147_v61  }
 0x3f3   :  { %v1367_v62 = vpop.f32.mrb[24].mxu1 }
 0x3f4   :  { %v930_v63 = vpop.f32.mrb[25].mxu1 }
 0x3f5   :  { %v1368_v0 = vpop.f32.mrb[26].mxu1 }
 0x3f6   :  { %v1162_v1 = vpack.c.bf16 %v1368_v0, %v1367_v62  ;;  %v933_v2 = vpop.f32.mrb[27].mxu1 }
 0x3f7   :  { %v1157_v3 = vpack.c.bf16 %v933_v2, %v930_v63 }
 0x3f8   :  { %1178 = vst [vmem:[#allocation12 + $0x28] sm:$0xff] %v1162_v1  }
 0x3f9   :  { %1177 = vst [vmem:[#allocation12 + $0x20] sm:$0xff] %v1157_v3  }
 0x3fb   :  { %v1371_v4 = vpop.f32.mrb[28].mxu1 }
 0x3fc   :  { %v946_v5 = vpop.f32.mrb[29].mxu1 }
 0x3fd   :  { %v1372_v6 = vpop.f32.mrb[30].mxu1 }
 0x3fe   :  { %v1172_v7 = vpack.c.bf16 %v1372_v6, %v1371_v4  ;;  %v949_v8 = vpop.f32.mrb[31].mxu1 }
 0x3ff   :  { %v1167_v9 = vpack.c.bf16 %v949_v8, %v946_v5 }
 0x400   :  { %1180 = vst [vmem:[#allocation12 + $0x38] sm:$0xff] %v1172_v7  }
 0x401   :  { %1179 = vst [vmem:[#allocation12 + $0x30] sm:$0xff] %v1167_v9  }
 0x402   :  { %1542 = shalt.err (!%p1539_p2)
}
 0x403   :  { %s1543_s21 = scalar_lea.hbm %s1726_s7, 1024 }
 0x404   :  { %p1544_p3 = scmp.ne.s32.totalorder %s1726_s7, %s1543_s21  ;;  %p1547_p4 = scmp.lt.u32.totalorder %s1543_s21, %s1726_s7 }
 0x406   :  { %p1549_p5 = pnand %p1547_p4, %p1544_p3 }
 0x408   :  { %1552 = shalt.err (!%p1549_p5)
}
 0x409   :  { %1052 = dma.vmem_to_hbm [thread:$0]  %s1047_s17, 1024, %s1726_s7, [#allocation5], %s1563_s13, %s1563_s13, %s1564_s14  }
 0x40a   :  { %1559 = dma.done.wait [#allocation5], 1024  }
 0x40b   :  { %1560 = vsyncadd [#allocation5], 4294966272 }
 0x40c   :  { %1056 = vsyncpa [#allocation4], 1 }
 0x40d   :  { %1057 = vsyncpa [#allocation7], 1 }
 0x40e   :  { %1058 = vsyncpa [#allocation10], 1 }
 0x40f   :  { %1059 = vsyncpa [#allocation5], 1 }

</bundles_post_ra>
